<compile_context>
chip_gen: v6e
topology: v6e:2x2x1
jax: 0.10.0
libtpu: 0.0.40
codegen_flags: <defaults>
</compile_context>

<pallas_src>
import functools

import jax
import jax.numpy as jnp
from jax.experimental import pallas as pl
from jax.experimental.pallas import tpu as pltpu


# ---------------------------------------------------------------------------
# Tiling helpers
# ---------------------------------------------------------------------------
def _round_up(x, m):
    return ((x + m - 1) // m) * m


def _tile_and_pad(dim, target, align):
    """Return (tile, padded_dim).

    tile is a multiple of `align` (or the full dim), tile <= max(target, dim),
    and tile evenly divides padded_dim.  padded_dim == dim unless no legal
    divisor exists, in which case dim is padded up to a multiple of the target
    tile (bounded tile size -> bounded VMEM)."""
    if dim <= target:
        return dim, dim                       # full-dim block: always legal
    t = (target // align) * align
    cand = t
    while cand >= align:
        if dim % cand == 0:
            return cand, dim                  # exact divisor, no padding
        cand -= align
    return t, _round_up(dim, t)               # pad instead of full-dim fallback


def _pick_tile(dim, target, align):
    """No-padding variant (used for the attention sequence axis)."""
    t, p = _tile_and_pad(dim, target, align)
    # TODO(synk): pad + in-kernel length masking for T that has no nice divisor.
    return t if p == dim else dim


# ---------------------------------------------------------------------------
# Kernel 1: tiled Linear  (y = x @ W + b), bf16 operands, f32 accumulation
# ---------------------------------------------------------------------------
def _linear_kernel_direct(x_ref, w_ref, b_ref, o_ref):
    """f32 output: accumulate directly into the resident output block."""
    k = pl.program_id(2)
    upd = jnp.dot(x_ref[...], w_ref[...], preferred_element_type=jnp.float32)

    @pl.when(k == 0)
    def _():
        o_ref[...] = b_ref[...] + upd

    @pl.when(k > 0)
    def _():
        o_ref[...] += upd


def _linear_kernel_acc(x_ref, w_ref, b_ref, o_ref, acc_ref):
    """Narrow (bf16) output: keep an f32 VMEM accumulator, cast once at the end."""
    k = pl.program_id(2)

    @pl.when(k == 0)
    def _():
        acc_ref[...] = jnp.zeros_like(acc_ref)

    acc_ref[...] += jnp.dot(x_ref[...], w_ref[...],
                            preferred_element_type=jnp.float32)

    @pl.when(k == pl.num_programs(2) - 1)
    def _():
        o_ref[...] = (acc_ref[...] + b_ref[...]).astype(o_ref.dtype)


def pallas_linear(x2d, w, b, *, out_dtype=jnp.float32, tm=256, tn=256, tk=512):
    """x2d: (M, K) (already in compute dtype), w: (K, N), b: (N,) -> (M, N)."""
    m, kdim = x2d.shape
    kdim2, n = w.shape
    assert kdim == kdim2

    tm, m_p = _tile_and_pad(m, tm, 8)
    tk, k_p = _tile_and_pad(kdim, tk, 128)
    tn, n_p = _tile_and_pad(n, tn, 128)

    if (m_p != m) or (k_p != kdim):
        x2d = jnp.pad(x2d, ((0, m_p - m), (0, k_p - kdim)))
    if (k_p != kdim) or (n_p != n):
        w = jnp.pad(w, ((0, k_p - kdim), (0, n_p - n)))
    b2d = b.astype(jnp.float32).reshape(1, n)
    if n_p != n:
        b2d = jnp.pad(b2d, ((0, 0), (0, n_p - n)))

    use_acc = (jnp.dtype(out_dtype) != jnp.dtype(jnp.float32))
    kernel = _linear_kernel_acc if use_acc else _linear_kernel_direct
    scratch = [pltpu.VMEM((tm, tn), jnp.float32)] if use_acc else []

    bytes_x = int(x2d.size) * x2d.dtype.itemsize
    bytes_w = int(w.size) * w.dtype.itemsize
    cost = pl.CostEstimate(
        flops=2 * m * n * kdim,
        transcendentals=0,
        bytes_accessed=bytes_x + bytes_w + m * n * jnp.dtype(out_dtype).itemsize + 4 * n,
    )

    out = pl.pallas_call(
        kernel,
        out_shape=jax.ShapeDtypeStruct((m_p, n_p), out_dtype),
        grid=(m_p // tm, n_p // tn, k_p // tk),
        in_specs=[
            pl.BlockSpec((tm, tk), lambda i, j, k: (i, k)),
            pl.BlockSpec((tk, tn), lambda i, j, k: (k, j)),
            pl.BlockSpec((1, tn), lambda i, j, k: (0, j)),
        ],
        out_specs=pl.BlockSpec((tm, tn), lambda i, j, k: (i, j)),
        scratch_shapes=scratch,
        compiler_params=pltpu.CompilerParams(
            dimension_semantics=("parallel", "parallel", "arbitrary"),
            # Tiles are ~1-2 MiB with double buffering: safe on every gen
            # (v7x has only 64 MiB physical VMEM).
            vmem_limit_bytes=32 * 1024 * 1024,
        ),
        cost_estimate=cost,
    )(x2d, w, b2d)

    if (m_p != m) or (n_p != n):
        out = out[:m, :n]
    return out


# ---------------------------------------------------------------------------
# Kernel 2: flash-attention SDPA (online softmax, causal skip, no mask bcast)
# ---------------------------------------------------------------------------
def _flash_kernel(*refs, has_bias, causal, tq, tkv):
    if has_bias:
        q_ref, k_ref, v_ref, bias_ref, o_ref, m_ref, l_ref, acc_ref = refs
    else:
        q_ref, k_ref, v_ref, o_ref, m_ref, l_ref, acc_ref = refs
        bias_ref = None

    qi = pl.program_id(2)
    kv = pl.program_id(3)

    @pl.when(kv == 0)
    def _():
        m_ref[...] = jnp.full_like(m_ref, -jnp.inf)
        l_ref[...] = jnp.zeros_like(l_ref)
        acc_ref[...] = jnp.zeros_like(acc_ref)

    def compute():
        q = q_ref[...]                       # (tq, hs)  bf16, pre-scaled by 1/sqrt(hs)
        k = k_ref[...]                       # (tkv, hs) bf16
        v = v_ref[...]                       # (tkv, hv) bf16
        # Contract over the last dim of both operands: no explicit k.T (no XLU
        # transpose / extra VMEM copy of the K tile).  f32 score accumulation.
        s = jax.lax.dot_general(q, k, (((1,), (1,)), ((), ())),
                                preferred_element_type=jnp.float32)   # (tq, tkv)
        if has_bias:
            s = s + bias_ref[...]            # precomputed additive bias (f32)
        if causal:
            row = qi * tq + jax.lax.broadcasted_iota(jnp.int32, (tq, tkv), 0)
            col = kv * tkv + jax.lax.broadcasted_iota(jnp.int32, (tq, tkv), 1)
            s = jnp.where(col > row, s - 1e9, s)   # matches mask * -1e9 semantics

        m_prev = m_ref[...]                                    # (tq, 1)
        m_new = jnp.maximum(m_prev, jnp.max(s, axis=-1, keepdims=True))
        alpha = jnp.exp(m_prev - m_new)
        p = jnp.exp(s - m_new)
        l_ref[...] = alpha * l_ref[...] + jnp.sum(p, axis=-1, keepdims=True)
        acc_ref[...] = alpha * acc_ref[...] + jnp.dot(
            p.astype(v.dtype), v, preferred_element_type=jnp.float32)
        m_ref[...] = m_new

    if causal:
        # Skip KV tiles that are entirely above the diagonal for this q tile.
        @pl.when(kv * tkv <= qi * tq + tq - 1)
        def _():
            compute()
    else:
        compute()

    @pl.when(kv == pl.num_programs(3) - 1)
    def _():
        inv_l = pl.reciprocal(l_ref[...], approx=True)   # EUP slot, ~free
        o_ref[...] = (acc_ref[...] * inv_l).astype(o_ref.dtype)


def pallas_flash_attention(q, k, v, *, num_heads, mask=None, is_causal=False,
                           tq=128, tkv=256, out_dtype=None):
    """q:(B,T,Dq) k:(B,T,Dk) v:(B,T,Dv) already projected; q pre-scaled.

    mask: optional shared (T, T) (or leading-1-broadcastable) mask, 1 = masked,
    applied as score += mask * -1e9 (PyTorch module semantics).
    is_causal=True generates the causal mask in-kernel (no mask DMA) and skips
    fully-masked KV tiles."""
    B, T, Dq = q.shape
    Dk, Dv = k.shape[-1], v.shape[-1]
    nh = num_heads
    hq, hk, hv = Dq // nh, Dk // nh, Dv // nh
    assert hq == hk, "per-head query/key dims must match"
    if out_dtype is None:
        out_dtype = v.dtype

    tq = _pick_tile(T, tq, 8)
    tkv = _pick_tile(T, tkv, 128)   # lane-dense score tiles
    grid = (B, nh, T // tq, T // tkv)

    causal = bool(is_causal)
    has_bias = (mask is not None) and not causal
    bias = None
    if has_bias:
        m2 = jnp.asarray(mask, jnp.float32)
        while m2.ndim > 2:
            if m2.shape[0] != 1:
                # TODO(synk): per-batch / per-head masks (needs a (B,nh)-indexed spec).
                raise NotImplementedError("only a shared (T, T) mask is supported")
            m2 = m2[0]
        if m2.shape != (T, T):
            m2 = jnp.broadcast_to(m2, (T, T))
        bias = m2 * jnp.float32(-1e9)        # shared additive bias, precomputed once

    def lane_dense(h, full):
        return (h % 128 == 0) or (h == full)

    direct = lane_dense(hq, Dq) and lane_dense(hk, Dk) and lane_dense(hv, Dv)

    inputs, in_specs = [], []
    if direct:
        # Heads addressed via index_map on the packed (B, T, D) layout: no
        # (B,T,nh,hs) <-> (B,nh,T,hs) transpose round trips through HBM, and
        # the output block is lane-dense (unmasked stores).
        in_specs += [
            pl.BlockSpec((None, tq, hq), lambda b, h, qi, ki: (b, qi, h)),
            pl.BlockSpec((None, tkv, hk), lambda b, h, qi, ki: (b, ki, h)),
            pl.BlockSpec((None, tkv, hv), lambda b, h, qi, ki: (b, ki, h)),
        ]
        inputs += [q, k, v]
        out_spec = pl.BlockSpec((None, tq, hv), lambda b, h, qi, ki: (b, qi, h))
        out_shape = jax.ShapeDtypeStruct((B, T, Dv), out_dtype)
    else:
        # Tiny head sizes (< 128 lanes): head-major layout so every block's
        # last dim equals the full array dim (always layout-legal).
        # TODO(synk): pack 128//hs heads per lane-dense (tq,128) block to drop
        # these transpose HBM passes entirely (biggest remaining lever at hs=64).
        q4 = q.reshape(B, T, nh, hq).transpose(0, 2, 1, 3)
        k4 = k.reshape(B, T, nh, hk).transpose(0, 2, 1, 3)
        v4 = v.reshape(B, T, nh, hv).transpose(0, 2, 1, 3)
        in_specs += [
            pl.BlockSpec((None, None, tq, hq), lambda b, h, qi, ki: (b, h, qi, 0)),
            pl.BlockSpec((None, None, tkv, hk), lambda b, h, qi, ki: (b, h, ki, 0)),
            pl.BlockSpec((None, None, tkv, hv), lambda b, h, qi, ki: (b, h, ki, 0)),
        ]
        inputs += [q4, k4, v4]
        out_spec = pl.BlockSpec((None, None, tq, hv),
                                lambda b, h, qi, ki: (b, h, qi, 0))
        out_shape = jax.ShapeDtypeStruct((B, nh, T, hv), out_dtype)

    if has_bias:
        # Shared (T, T) bias tile -- no (B, nh, T, T) broadcast in HBM.
        in_specs.append(pl.BlockSpec((tq, tkv), lambda b, h, qi, ki: (qi, ki)))
        inputs.append(bias)

    work = 0.5 if causal else 1.0
    cost = pl.CostEstimate(
        flops=int(2 * B * nh * T * T * (hq + hv) * work),
        transcendentals=int(B * nh * T * T * work),
        bytes_accessed=int(q.size * q.dtype.itemsize + k.size * k.dtype.itemsize
                           + v.size * v.dtype.itemsize
                           + B * T * Dv * jnp.dtype(out_dtype).itemsize
                           + (4 * T * T if has_bias else 0)),
    )

    # NOTE: on v6e/v7x, sweeping tkv up to 512 and pipeline_mode=pl.Buffered(3)
    # on the K/V specs can hide KV DMA latency once the mask DMA is gone.
    out = pl.pallas_call(
        functools.partial(_flash_kernel, has_bias=has_bias, causal=causal,
                          tq=tq, tkv=tkv),
        out_shape=out_shape,
        grid=grid,
        in_specs=in_specs,
        out_specs=out_spec,
        scratch_shapes=[
            pltpu.VMEM((tq, 1), jnp.float32),    # running max  m
            pltpu.VMEM((tq, 1), jnp.float32),    # running denom l
            pltpu.VMEM((tq, hv), jnp.float32),   # un-normalized accumulator
        ],
        compiler_params=pltpu.CompilerParams(
            dimension_semantics=("parallel", "parallel", "parallel", "arbitrary"),
            vmem_limit_bytes=32 * 1024 * 1024,
        ),
        cost_estimate=cost,
    )(*inputs)

    if not direct:
        out = out.transpose(0, 2, 1, 3).reshape(B, T, Dv)
    return out


# ---------------------------------------------------------------------------
# MultiHeadAttention wrapper (parameter container + forward glue)
# ---------------------------------------------------------------------------
class MultiHeadAttentionPallas:
    def __init__(self, num_heads, embed_size, key_dim, query_dim, value_dim,
                 key=None, compute_dtype=jnp.bfloat16):
        if key is None:
            key = jax.random.PRNGKey(0)
        self.num_heads = num_heads
        self.embed_size = embed_size
        self.key_dim = key_dim
        self.query_dim = query_dim
        self.value_dim = value_dim
        # bf16 feeds the MXU's native operand dtype on v5e/v6e/v7x; all
        # accumulation stays f32 in the kernels.
        self.compute_dtype = compute_dtype

        # nn.Linear-style init: U(-1/sqrt(fan_in), 1/sqrt(fan_in)), W as (in,out)
        def init_linear(k, fan_in, fan_out):
            kw, kb = jax.random.split(k)
            bound = 1.0 / float(fan_in) ** 0.5
            w = jax.random.uniform(kw, (fan_in, fan_out), jnp.float32, -bound, bound)
            b = jax.random.uniform(kb, (fan_out,), jnp.float32, -bound, bound)
            return w, b

        k1, k2, k3, k4 = jax.random.split(key, 4)
        self.wq, self.bq = init_linear(k1, embed_size, query_dim)   # f32 masters
        self.wk, self.bk = init_linear(k2, embed_size, key_dim)
        self.wv, self.bv = init_linear(k3, embed_size, value_dim)
        self.wo, self.bo = init_linear(k4, value_dim, embed_size)

        hs = query_dim // num_heads
        self.scale = 1.0 / float(hs) ** 0.5

        # Compute-dtype (bf16) weight copies, stored once (no per-step casts,
        # half the weight-tile DMA bytes).  1/sqrt(hs) folded into Wq/bq.
        cd = compute_dtype
        self.wq_c = (self.wq * self.scale).astype(cd)
        self.bq_c = self.bq * self.scale                 # biases stay f32
        self.wk_c = self.wk.astype(cd)
        self.wv_c = self.wv.astype(cd)
        self.wo_c = self.wo.astype(cd)
        # Fused QKV weights: one pallas_call shares the x-tile DMA across all
        # three projections (used when query is key is value).
        self.w_qkv = jnp.concatenate([self.wq_c, self.wk_c, self.wv_c], axis=1)
        self.b_qkv = jnp.concatenate([self.bq_c, self.bk, self.bv])

    def __call__(self, query, key, value, mask=None, is_causal=False):
        B, T, C = query.shape
        dq, dk, dv = self.query_dim, self.key_dim, self.value_dim
        cd = self.compute_dtype

        if (query is key) and (key is value):
            x = query.reshape(B * T, C).astype(cd)
            qkv = pallas_linear(x, self.w_qkv, self.b_qkv, out_dtype=cd)
            q2d = qkv[:, :dq]
            k2d = qkv[:, dq:dq + dk]
            v2d = qkv[:, dq + dk:]
        else:
            q2d = pallas_linear(query.reshape(B * T, C).astype(cd),
                                self.wq_c, self.bq_c, out_dtype=cd)
            k2d = pallas_linear(key.reshape(B * T, C).astype(cd),
                                self.wk_c, self.bk, out_dtype=cd)
            v2d = pallas_linear(value.reshape(B * T, C).astype(cd),
                                self.wv_c, self.bv, out_dtype=cd)

        attn = pallas_flash_attention(
            q2d.reshape(B, T, dq), k2d.reshape(B, T, dk), v2d.reshape(B, T, dv),
            num_heads=self.num_heads, mask=mask, is_causal=is_causal,
            out_dtype=cd)                                        # (B, T, value_dim)

        out = pallas_linear(attn.reshape(B * T, dv), self.wo_c, self.bo,
                            out_dtype=jnp.float32)
        return out.reshape(B, T, self.embed_size)


# ---------------------------------------------------------------------------
# Pure-JAX reference (mirrors the PyTorch math), full-f32 precision
# ---------------------------------------------------------------------------
def reference_forward(mha, query, key, value, mask=None):
    hp = jax.lax.Precision.HIGHEST
    B, T, C = query.shape
    nh = mha.num_heads
    q = jnp.dot(query.reshape(B * T, C), mha.wq, precision=hp) + mha.bq
    k = jnp.dot(key.reshape(B * T, C), mha.wk, precision=hp) + mha.bk
    v = jnp.dot(value.reshape(B * T, C), mha.wv, precision=hp) + mha.bv
    q = q.reshape(B, T, nh, -1).transpose(0, 2, 1, 3)
    k = k.reshape(B, T, nh, -1).transpose(0, 2, 1, 3)
    v = v.reshape(B, T, nh, -1).transpose(0, 2, 1, 3)
    hs = q.shape[-1]
    s = jnp.einsum('bhtd,bhsd->bhts', q, k, precision=hp) / jnp.sqrt(
        jnp.float32(hs))
    if mask is not None:
        s = s + mask * (-1e9)
    w = jax.nn.softmax(s, axis=-1)
    o = jnp.einsum('bhts,bhsd->bhtd', w, v, precision=hp)
    o = o.transpose(0, 2, 1, 3).reshape(B * T, -1)
    return (jnp.dot(o, mha.wo, precision=hp) + mha.bo).reshape(B, T, -1)


def _check(out, ref, name, atol=2e-2, rtol=2e-2):
    err = float(jnp.max(jnp.abs(out - ref)))
    assert jnp.allclose(out, ref, atol=atol, rtol=rtol), (name, err)


if __name__ == "__main__":
    root = jax.random.PRNGKey(0)
    kp1, kq, kk, kv, kx, kp2, kx2 = jax.random.split(root, 7)

    # --- test 1: cross-attention, tiny heads (hs=8 -> head-major fallback) ---
    B, T, E, H = 2, 8, 32, 4
    mha = MultiHeadAttentionPallas(H, E, key_dim=E, query_dim=E, value_dim=E,
                                   key=kp1)
    q_in = jax.random.normal(kq, (B, T, E), jnp.float32)
    k_in = jax.random.normal(kk, (B, T, E), jnp.float32)
    v_in = jax.random.normal(kv, (B, T, E), jnp.float32)
    out1 = jax.block_until_ready(mha(q_in, k_in, v_in))
    assert out1.shape == (B, T, E)
    _check(out1, reference_forward(mha, q_in, k_in, v_in), "cross-attn")

    # --- test 2: self-attention + explicit (T,T) additive mask (bias path) ---
    x = jax.random.normal(kx, (B, T, E), jnp.float32)
    causal = jnp.triu(jnp.ones((T, T), jnp.float32), k=1)   # 1 = masked
    ref_masked = reference_forward(mha, x, x, x, mask=causal)
    out2 = jax.block_until_ready(mha(x, x, x, mask=causal))
    _check(out2, ref_masked, "masked-bias")

    # --- test 3: same, but with the in-kernel causal mask + tile skipping ---
    out3 = jax.block_until_ready(mha(x, x, x, is_causal=True))
    _check(out3, ref_masked, "masked-causal")

    # --- test 4: lane-dense heads (hs=128), multi-tile flash + tiled linears ---
    B4, T4, E4, H4 = 1, 512, 256, 2
    mha4 = MultiHeadAttentionPallas(H4, E4, key_dim=E4, query_dim=E4,
                                    value_dim=E4, key=kp2)
    x4 = jax.random.normal(kx2, (B4, T4, E4), jnp.float32)
    out4 = jax.block_until_ready(mha4(x4, x4, x4))
    _check(out4, reference_forward(mha4, x4, x4, x4), "lane-dense")

    causal4 = jnp.triu(jnp.ones((T4, T4), jnp.float32), k=1)
    out5 = jax.block_until_ready(mha4(x4, x4, x4, is_causal=True))
    _check(out5, reference_forward(mha4, x4, x4, x4, mask=causal4),
           "lane-dense-causal")

    print("KERNEL_OK")
</pallas_src>

<mosaic_0001>
module attributes {stable_mosaic.version = 11 : i64} {
  func.func @_linear_kernel_acc(%arg0: i32, %arg1: i32, %arg2: i32, %arg3: memref<16x32xbf16, #tpu.memory_space<vmem>>, %arg4: memref<32x32xbf16, #tpu.memory_space<vmem>>, %arg5: memref<1x32xf32, #tpu.memory_space<vmem>>, %arg6: memref<16x32xbf16, #tpu.memory_space<vmem>>, %arg7: memref<16x32xf32, #tpu.memory_space<vmem>>) attributes {dimension_semantics = [#tpu.dimension_semantics<parallel>, #tpu.dimension_semantics<parallel>, #tpu.dimension_semantics<arbitrary>], iteration_bounds = array<i64: 1, 1, 1>, scalar_prefetch = 0 : i64, scratch_operands = 1 : i64, tpu.core_type = #tpu.core_type<tc>, window_params = [{transform_indices = @transform_0, window_bounds = array<i64: 16, 32>}, {transform_indices = @transform_1, window_bounds = array<i64: 32, 32>}, {transform_indices = @transform_2, window_bounds = array<i64: 1, 32>}, {transform_indices = @transform_3, window_bounds = array<i64: 16, 32>}]} {
    %c0_i32 = arith.constant 0 : i32
    %0 = arith.cmpi eq, %arg2, %c0_i32 : i32
    %1 = arith.extui %0 : i1 to i32
    %c0_i32_0 = arith.constant 0 : i32
    %2 = arith.cmpi ne, %1, %c0_i32_0 : i32
    scf.if %2 {
      %cst_10 = arith.constant 0.000000e+00 : f32
      %12 = vector.broadcast %cst_10 : f32 to vector<16x32xf32>
      %c0_11 = arith.constant 0 : index
      %c0_12 = arith.constant 0 : index
      %13 = vector.load %arg7[%c0_11, %c0_12] : memref<16x32xf32, #tpu.memory_space<vmem>>, vector<16x32xf32>
      tpu.vector_store %arg7[%c0_11, %c0_12], %12 {strides = array<i32>} : memref<16x32xf32, #tpu.memory_space<vmem>>, vector<16x32xf32>,
    } else {
    }
    %c0 = arith.constant 0 : index
    %c0_1 = arith.constant 0 : index
    %3 = vector.load %arg7[%c0, %c0_1] : memref<16x32xf32, #tpu.memory_space<vmem>>, vector<16x32xf32>
    %c0_2 = arith.constant 0 : index
    %c0_3 = arith.constant 0 : index
    %4 = vector.load %arg3[%c0_2, %c0_3] : memref<16x32xbf16, #tpu.memory_space<vmem>>, vector<16x32xbf16>
    %c0_4 = arith.constant 0 : index
    %c0_5 = arith.constant 0 : index
    %5 = vector.load %arg4[%c0_4, %c0_5] : memref<32x32xbf16, #tpu.memory_space<vmem>>, vector<32x32xbf16>
    %cst = arith.constant dense<0.000000e+00> : vector<16x32xf32>
    %6 = tpu.matmul %4, %5, %cst {dimension_numbers = #tpu.dot_dimension_numbers<[1], [0], [0], [1], [0, 0, 1, 1], [], []>} : vector<16x32xbf16>, vector<32x32xbf16>, vector<16x32xf32> -> vector<16x32xf32>
    %7 = arith.addf %3, %6 : vector<16x32xf32>
    %c0_6 = arith.constant 0 : index
    %c0_7 = arith.constant 0 : index
    %8 = vector.load %arg7[%c0_6, %c0_7] : memref<16x32xf32, #tpu.memory_space<vmem>>, vector<16x32xf32>
    tpu.vector_store %arg7[%c0_6, %c0_7], %7 {strides = array<i32>} : memref<16x32xf32, #tpu.memory_space<vmem>>, vector<16x32xf32>,
    %c0_i32_8 = arith.constant 0 : i32
    %9 = arith.cmpi eq, %arg2, %c0_i32_8 : i32
    %10 = arith.extui %9 : i1 to i32
    %c0_i32_9 = arith.constant 0 : i32
    %11 = arith.cmpi ne, %10, %c0_i32_9 : i32
    scf.if %11 {
      %c0_10 = arith.constant 0 : index
      %c0_11 = arith.constant 0 : index
      %12 = vector.load %arg7[%c0_10, %c0_11] : memref<16x32xf32, #tpu.memory_space<vmem>>, vector<16x32xf32>
      %c0_12 = arith.constant 0 : index
      %c0_13 = arith.constant 0 : index
      %13 = vector.load %arg5[%c0_12, %c0_13] : memref<1x32xf32, #tpu.memory_space<vmem>>, vector<1x32xf32>
      %14 = vector.broadcast %13 : vector<1x32xf32> to vector<16x32xf32>
      %15 = arith.addf %12, %14 : vector<16x32xf32>
      %16 = arith.truncf %15 : vector<16x32xf32> to vector<16x32xbf16>
      %c0_14 = arith.constant 0 : index
      %c0_15 = arith.constant 0 : index
      %17 = vector.load %arg6[%c0_14, %c0_15] : memref<16x32xbf16, #tpu.memory_space<vmem>>, vector<16x32xbf16>
      tpu.vector_store %arg6[%c0_14, %c0_15], %16 {strides = array<i32>} : memref<16x32xbf16, #tpu.memory_space<vmem>>, vector<16x32xbf16>,
    } else {
    }
    return
  }
  func.func @transform_0(%arg0: i32, %arg1: i32, %arg2: i32) -> (i32, i32) {
    %c0_i32 = arith.constant 0 : i32
    return %arg0, %arg2 : i32, i32
  }
  func.func @transform_1(%arg0: i32, %arg1: i32, %arg2: i32) -> (i32, i32) {
    %c0_i32 = arith.constant 0 : i32
    return %arg2, %arg1 : i32, i32
  }
  func.func @transform_2(%arg0: i32, %arg1: i32, %arg2: i32) -> (i32, i32) {
    %c0_i32 = arith.constant 0 : i32
    %c0_i32_0 = arith.constant 0 : i32
    return %c0_i32, %arg1 : i32, i32
  }
  func.func @transform_3(%arg0: i32, %arg1: i32, %arg2: i32) -> (i32, i32) {
    %c0_i32 = arith.constant 0 : i32
    return %arg0, %arg1 : i32, i32
  }
}

</mosaic_0001>

<bundles_post_ra>
// kernel: tpu_custom_call.1
= control target key start
LH: loop header
LB: loop body
LE: loop exit
PB: predicated region body
PF: predicated region fallthrough
CT: control target
= control target key end

     0   :  { %8 = vsyncpa [#allocation4], 0  ;;  %s317_s0 = inlined_call_operand.hbm [shape: bf16[16,32], index: 0, kind: input, shape index: {}]   ;;  %s318_s1 = inlined_call_operand.hbm [shape: bf16[32,32], index: 1, kind: input, shape index: {}]   ;;  %s319_s2 = inlined_call_operand.vmem [shape: f32[1,32], index: 2, kind: input, shape index: {}]   ;;  %s320_s3 = inlined_call_operand.hbm [shape: bf16[16,32], index: 3, kind: output, shape index: {}]  }
   0x1   :  { %9 = vsyncpa [#allocation7], 0 }
   0x2   :  { %10 = vsyncpa [#allocation5], 0  ;;  %s264_s12 = smov [#allocation3]  }
   0x3   :  { %s16_s13 = sshll.u32 %s264_s12, 4  ;;  %s17_s13 = int_to_ptr.vmem [resolvable:$true] %s16_s13 }
   0x4   :  { %s206_s14 = scalar_lea.vmem %s17_s13, 128  ;;  %p211_p1 = scmp.lt.s32.totalorder %s17_s13, %s17_s13 }
   0x5   :  { %p207_p0 = scmp.ne.s32.totalorder %s17_s13, %s206_s14  ;;  %p212_p2 = scmp.lt.s32.totalorder %s206_s14, %s206_s14 }
   0x7   :  { %p213_p3 = por %p212_p2, %p211_p1 }
   0x9   :  { %p214_p4 = pnand %p213_p3, %p207_p0 }
   0xb   :  { %217 = shalt.err (!%p214_p4)
}
   0xc   :  { %s265_s15 = smov 64   ;;  %s266_s16 = smov 4  }
   0xd   :  { %22 = dma.hbm_to_vmem [thread:$0]  %s317_s0, 128, %s17_s13, [#allocation4], %s265_s15, %s265_s15, %s266_s16  }
   0xe   :  { %s267_s19 = smov [#allocation6]  }
   0xf   :  { %s28_s20 = sshll.u32 %s267_s19, 4  ;;  %s29_s20 = int_to_ptr.vmem [resolvable:$true] %s28_s20 }
  0x10   :  { %s226_s21 = scalar_lea.vmem %s29_s20, 256  ;;  %p231_p6 = scmp.lt.s32.totalorder %s29_s20, %s29_s20 }
  0x11   :  { %p227_p5 = scmp.ne.s32.totalorder %s29_s20, %s226_s21  ;;  %p232_p7 = scmp.lt.s32.totalorder %s226_s21, %s226_s21 }
  0x13   :  { %p233_p8 = por %p232_p7, %p231_p6 }
  0x15   :  { %p234_p9 = pnand %p233_p8, %p227_p5 }
  0x17   :  { %237 = shalt.err (!%p234_p9)
}
  0x18   :  { %34 = dma.hbm_to_vmem [thread:$0]  %s318_s1, 256, %s29_s20, [#allocation7], %s265_s15, %s265_s15, %s266_s16  }
  0x19   :  { %258 = dma.done.wait [#allocation4], 128  }
  0x1a   :  { %259 = vsyncadd [#allocation4], 4294967168 }
  0x1b   :  { %260 = dma.done.wait [#allocation7], 256  }
  0x1c   :  { %261 = vsyncadd [#allocation7], 4294967040  ;;  %vm48_vm0 = vcmask 261120   ;;  %v268_v0 = vmov 0.0   ;;  %vm269_vm1 = vmmov 0   ;;  %v195_v1 = vld [vmem:[#allocation6 + $0x8] sm:$0xff]  }
  0x1d   :  { %180 = vmatprep.subr.bf16.mxu0 %v268_v0  ;;  %184 = vmatprep.mubr.msk.bf16.mxu0 %vm269_vm1, %v268_v0  ;;  %49 = vst.msk [vmem:[#allocation2] sm:$0xff] %vm48_vm0, %v268_v0  ;;  %50 = vst.msk [vmem:[#allocation2 + $0x8] sm:$0xff] %vm48_vm0, %v268_v0  ;;  %v196_v2 = vld [vmem:[#allocation6] sm:$0xff]   ;;  %v197_v3 = vld [vmem:[#allocation3] sm:$0xff]   ;;  %vm147_vm2 = vcmask 257024   ;;  %s270_s24 = smov [#allocation8]  }
  0x1e   :  { %181 = vmatpush3.bf16.msra.mxu0 %v195_v1  ;;  %v172_v12 = vld [vmem:[%s319_s2] ss:$0 sm:$0xff]  ;;  %s155_s25 = sshll.u32 %s270_s24, 4  ;;  %s156_s25 = int_to_ptr.vmem [resolvable:$true] %s155_s25 }
  0x1f   :  { %182 = vmatprep.subr.bf16.mxu0 %v268_v0  ;;  %s238_s26 = scalar_lea.vmem %s156_s25, 128  ;;  %p243_p11 = scmp.lt.s32.totalorder %s156_s25, %s156_s25 }
  0x20   :  { %p239_p10 = scmp.ne.s32.totalorder %s156_s25, %s238_s26  ;;  %p244_p12 = scmp.lt.s32.totalorder %s238_s26, %s238_s26 }
  0x22   :  { %183 = vmatpush3.bf16.msra.mxu0 %v196_v2  ;;  %p245_p13 = por %p244_p12, %p243_p11 }
  0x24   :  { %v51_v4 = vld [vmem:[#allocation2] sm:$0xff]  ;;  %v52_v8 = vld [vmem:[#allocation2 + $0x8] sm:$0xff]  ;;  %p246_p0 = pnand %p245_p13, %p239_p10 }
  0x25   :  { %185 = vmatmul.mubr.msk.bf16.vlgmr.msra.gmra.mxu0 %vm48_vm0, %v197_v3 }
  0xe5   :  { %v114_v5 = vpop.f32.mrf.mxu0 }
  0xe6   :  { %v121_v6 = vadd.f32 %v114_v5, %v51_v4 }
  0xe7   :  { %v186_v7 = vpop.f32.mrf.mxu0 }
  0xe8   :  { %123 = vst.msk [vmem:[#allocation2] sm:$0xff] %vm48_vm0, %v121_v6 }
  0xe9   :  { %v117_v9 = vpop.f32.mrf.mxu0 }
  0xea   :  { %v122_v10 = vadd.f32 %v117_v9, %v52_v8 }
  0xeb   :  { %v187_v11 = vpop.f32.mrf.mxu0 }
  0xec   :  { %124 = vst.msk [vmem:[#allocation2 + $0x8] sm:$0xff] %vm48_vm0, %v122_v10 }
  0xef   :  { %v128_v13 = vld [vmem:[#allocation2] sm:$0xff] }
  0xf0   :  { %v137_v14 = vadd.f32 %v172_v12, %v128_v13 }
  0xf2   :  { %v175_v15 = vpack.c.bf16 %v137_v14, %v137_v14 }
  0xf3   :  { %v129_v16 = vld [vmem:[#allocation2 + $0x8] sm:$0xff] }
  0xf4   :  { %v138_v17 = vadd.f32 %v172_v12, %v129_v16  ;;  %148 = vst.msk [vmem:[#allocation8] sm:$0xf] %vm147_vm2, %v175_v15 }
  0xf6   :  { %v176_v18 = vpack.c.bf16 %v138_v17, %v138_v17 }
  0xf8   :  { %149 = vst.msk [vmem:[#allocation8 + $0x4] sm:$0xf] %vm147_vm2, %v176_v18 }
  0xf9   :  { %249 = shalt.err (!%p246_p0)
}
  0xfa   :  { %161 = dma.vmem_to_hbm [thread:$0]  %s156_s25, 128, %s320_s3, [#allocation5], %s265_s15, %s265_s15, %s266_s16  }
  0xfb   :  { %262 = dma.done.wait [#allocation5], 128  }
  0xfc   :  { %263 = vsyncadd [#allocation5], 4294967168 }
  0xfd   :  { %165 = vsyncpa [#allocation4], 1 }
  0xfe   :  { %166 = vsyncpa [#allocation7], 1 }
  0xff   :  { %167 = vsyncpa [#allocation5], 1 }

</bundles_post_ra>
